<compile_context>
chip_gen: v7x
topology: tpu7x:2x2x1
jax: 0.10.0
libtpu: 0.0.40
codegen_flags: <defaults>
</compile_context>

<pallas_src>
import jax
import jax.numpy as jnp
from jax.experimental import pallas as pl
from jax.experimental.pallas import tpu as pltpu

_LANE = 128
_NEG_INF = -1e30  # pad-class bias: exp() underflows to exactly 0 (f32/bf16 safe)


def _linear_softmax_kernel(x_ref, w_ref, b_ref, o_ref):
    # (TB, F) @ (F, O_pad) on the MXU, f32 accumulation.
    y = jnp.dot(x_ref[...], w_ref[...], preferred_element_type=jnp.float32)
    y = y + b_ref[...]
    # Numerically-stable softmax along the last (lane) axis == PyTorch dim=1.
    # Padded classes carry a -1e30 bias so they contribute exactly 0.
    m = jnp.max(y, axis=-1, keepdims=True)
    e = jnp.exp(y - m)
    denom = jnp.sum(e, axis=-1, keepdims=True)
    probs = e / denom  # exact divide: rows sum to 1 within f32 rounding
    # Narrow store: only the real classes are written back (masked vst, cheap at O=8).
    o_ref[...] = probs[:, : o_ref.shape[-1]].astype(o_ref.dtype)


def prepare_params(w, b):
    """One-time parameter setup (hoisted out of the per-call path).

    w: (F, O) f32 (transpose of PyTorch fc1.weight), b: (1, O) f32.
    Returns (w_pad, b_pad, O) with the class dim padded to a multiple of 128
    so the MXU N-dim is lane-dense; padded classes get a -1e30 bias.
    """
    F, O = w.shape
    O_pad = max(_LANE, ((O + _LANE - 1) // _LANE) * _LANE)
    if O_pad != O:
        w = jnp.pad(w, ((0, 0), (0, O_pad - O)))
        b = jnp.pad(b, ((0, 0), (0, O_pad - O)), constant_values=_NEG_INF)
    return w, b, O


def network_forward(x, w_pad, b_pad, num_classes, *, block_b=2048):
    """softmax(x @ W.T + b, dim=1) for the Network module.

    x: (B, F) f32; w_pad: (F, O_pad) f32; b_pad: (1, O_pad) f32 (from
    prepare_params). Returns (B, num_classes) f32.
    """
    B, F = x.shape
    _, O_pad = w_pad.shape
    O = num_classes

    # Batch tile: bucket to powers of two (>= 8 for sublane alignment) so
    # different batch sizes reuse one compiled kernel; big tiles amortize the
    # ~0.35us per-grid-step overhead. Non-divisible grids are handled by
    # Pallas boundary masking (no wrapper-side padding pass over x).
    TB = int(min(block_b, max(8, pl.next_power_of_2(B))))
    n_tiles = pl.cdiv(B, TB)

    # VMEM footprint: double-buffered x / out tiles + resident W/b + headroom
    # for the (TB, O_pad) f32 intermediates. Tiny even on v7x (64 MiB/TC).
    vmem_bytes = 4 * (2 * TB * F + 2 * TB * O + 2 * F * O_pad + 2 * O_pad
                      + 4 * TB * O_pad)
    vmem_limit = int(min(max(2 * vmem_bytes, 8 << 20), 48 << 20))

    cost = pl.CostEstimate(
        flops=2 * B * F * O_pad + 5 * B * O_pad,
        transcendentals=B * O_pad,
        bytes_accessed=4 * (B * F + F * O_pad + O_pad + B * O),
    )

    out = pl.pallas_call(
        _linear_softmax_kernel,
        out_shape=jax.ShapeDtypeStruct((B, O), jnp.float32),
        grid=(n_tiles,),
        in_specs=[
            pl.BlockSpec((TB, F), lambda i: (i, 0)),       # streamed x tile
            pl.BlockSpec((F, O_pad), lambda i: (0, 0)),    # VMEM-resident W
            pl.BlockSpec((1, O_pad), lambda i: (0, 0)),    # VMEM-resident b
        ],
        # O equals the full array dim -> legal block; narrow masked stores
        # beat a 16x-inflated padded writeback + wrapper slice pass.
        out_specs=pl.BlockSpec((TB, O), lambda i: (i, 0)),
        compiler_params=pltpu.CompilerParams(
            dimension_semantics=("parallel",),   # 2-TC sharding on v7x
            vmem_limit_bytes=vmem_limit,
        ),
        cost_estimate=cost,
    )(x, w_pad, b_pad)

    return out


if __name__ == "__main__":
    # Small shapes consistent with the module: batch=8, input_feature=32, output=8.
    B, F, O = 8, 32, 8

    key = jax.random.PRNGKey(0)
    kx, kw, kb = jax.random.split(key, 3)

    x = jax.random.normal(kx, (B, F), dtype=jnp.float32)

    # nn.init.normal_(weight, mean=0, std=0.1); PyTorch weight is (O, F),
    # we store its transpose (F, O) so the kernel computes x @ W == x @ weight.T.
    w_pt = 0.1 * jax.random.normal(kw, (O, F), dtype=jnp.float32)
    w = w_pt.T

    # PyTorch Linear default bias init: U(-1/sqrt(F), 1/sqrt(F)).
    bound = 1.0 / jnp.sqrt(jnp.float32(F))
    b = jax.random.uniform(kb, (1, O), minval=-bound, maxval=bound,
                           dtype=jnp.float32)

    # One-time parameter setup (lane-dense padding done once, not per call).
    w_pad, b_pad, n_classes = prepare_params(w, b)

    out = network_forward(x, w_pad, b_pad, n_classes)
    jax.block_until_ready(out)

    # Reference in plain JAX.
    ref = jax.nn.softmax(x @ w + b, axis=1)
    assert out.shape == (B, O)
    assert jnp.allclose(out, ref, atol=1e-4, rtol=1e-4), "mismatch vs reference"
    assert jnp.allclose(jnp.sum(out, axis=1), 1.0, atol=1e-4), "rows must sum to 1"

    # Exercise the multi-tile, non-divisible-grid path (boundary rows masked).
    B2 = 600
    x2 = jax.random.normal(jax.random.PRNGKey(1), (B2, F), dtype=jnp.float32)
    out2 = network_forward(x2, w_pad, b_pad, n_classes, block_b=256)
    jax.block_until_ready(out2)
    ref2 = jax.nn.softmax(x2 @ w + b, axis=1)
    assert out2.shape == (B2, O)
    assert jnp.allclose(out2, ref2, atol=1e-4, rtol=1e-4), "tiled path mismatch"
    assert jnp.allclose(jnp.sum(out2, axis=1), 1.0, atol=1e-4)

    print("KERNEL_OK")
</pallas_src>

<mosaic_0001>
module attributes {stable_mosaic.version = 11 : i64} {
  func.func @_linear_softmax_kernel(%arg0: i32, %arg1: memref<8x32xf32, #tpu.memory_space<vmem>>, %arg2: memref<32x128xf32, #tpu.memory_space<vmem>>, %arg3: memref<1x128xf32, #tpu.memory_space<vmem>>, %arg4: memref<8x8xf32, #tpu.memory_space<vmem>>) attributes {dimension_semantics = [#tpu.dimension_semantics<parallel>], iteration_bounds = array<i64: 1>, scalar_prefetch = 0 : i64, scratch_operands = 0 : i64, tpu.core_type = #tpu.core_type<tc>, window_params = [{transform_indices = @transform_0, window_bounds = array<i64: 8, 32>}, {pipeline_mode = #tpu.pipeline_mode<synchronous>, transform_indices = @transform_1, window_bounds = array<i64: 32, 128>}, {pipeline_mode = #tpu.pipeline_mode<synchronous>, transform_indices = @transform_2, window_bounds = array<i64: 1, 128>}, {transform_indices = @transform_3, window_bounds = array<i64: 8, 8>}]} {
    %c0 = arith.constant 0 : index
    %c0_0 = arith.constant 0 : index
    %0 = vector.load %arg1[%c0, %c0_0] : memref<8x32xf32, #tpu.memory_space<vmem>>, vector<8x32xf32>
    %c0_1 = arith.constant 0 : index
    %c0_2 = arith.constant 0 : index
    %1 = vector.load %arg2[%c0_1, %c0_2] : memref<32x128xf32, #tpu.memory_space<vmem>>, vector<32x128xf32>
    %cst = arith.constant dense<0.000000e+00> : vector<8x128xf32>
    %2 = tpu.matmul %0, %1, %cst {dimension_numbers = #tpu.dot_dimension_numbers<[1], [0], [0], [1], [0, 0, 1, 1], [], []>} : vector<8x32xf32>, vector<32x128xf32>, vector<8x128xf32> -> vector<8x128xf32>
    %c0_3 = arith.constant 0 : index
    %c0_4 = arith.constant 0 : index
    %3 = vector.load %arg3[%c0_3, %c0_4] : memref<1x128xf32, #tpu.memory_space<vmem>>, vector<1x128xf32>
    %4 = vector.broadcast %3 : vector<1x128xf32> to vector<8x128xf32>
    %5 = arith.addf %2, %4 : vector<8x128xf32>
    %cst_5 = arith.constant dense<0xFF800000> : vector<8xf32>
    %6 = vector.multi_reduction <maximumf>, %5, %cst_5 [1] : vector<8x128xf32> to vector<8xf32>
    %7 = vector.shape_cast %6 : vector<8xf32> to vector<8x1xf32>
    %8 = vector.broadcast %7 : vector<8x1xf32> to vector<8x128xf32>
    %9 = arith.subf %5, %8 : vector<8x128xf32>
    %10 = math.exp %9 : vector<8x128xf32>
    %cst_6 = arith.constant dense<0.000000e+00> : vector<8xf32>
    %11 = vector.multi_reduction <add>, %10, %cst_6 [1] : vector<8x128xf32> to vector<8xf32>
    %12 = vector.shape_cast %11 : vector<8xf32> to vector<8x1xf32>
    %13 = vector.broadcast %12 : vector<8x1xf32> to vector<8x128xf32>
    %14 = arith.divf %10, %13 : vector<8x128xf32>
    %15 = vector.extract_strided_slice %14 {offsets = [0, 0], sizes = [8, 8], strides = [1, 1]} : vector<8x128xf32> to vector<8x8xf32>
    %c0_7 = arith.constant 0 : index
    %c0_8 = arith.constant 0 : index
    %16 = vector.load %arg4[%c0_7, %c0_8] : memref<8x8xf32, #tpu.memory_space<vmem>>, vector<8x8xf32>
    tpu.vector_store %arg4[%c0_7, %c0_8], %15 {strides = array<i32>} : memref<8x8xf32, #tpu.memory_space<vmem>>, vector<8x8xf32>,
    return
  }
  func.func @transform_0(%arg0: i32) -> (i32, i32) {
    %c0_i32 = arith.constant 0 : i32
    %c0_i32_0 = arith.constant 0 : i32
    return %arg0, %c0_i32 : i32, i32
  }
  func.func @transform_1(%arg0: i32) -> (i32, i32) {
    %c0_i32 = arith.constant 0 : i32
    %c0_i32_0 = arith.constant 0 : i32
    %c0_i32_1 = arith.constant 0 : i32
    return %c0_i32, %c0_i32_0 : i32, i32
  }
  func.func @transform_2(%arg0: i32) -> (i32, i32) {
    %c0_i32 = arith.constant 0 : i32
    %c0_i32_0 = arith.constant 0 : i32
    %c0_i32_1 = arith.constant 0 : i32
    return %c0_i32, %c0_i32_0 : i32, i32
  }
  func.func @transform_3(%arg0: i32) -> (i32, i32) {
    %c0_i32 = arith.constant 0 : i32
    %c0_i32_0 = arith.constant 0 : i32
    return %arg0, %c0_i32 : i32, i32
  }
}

</mosaic_0001>

<bundles_post_ra>
// kernel: tpu_custom_call.1
= control target key start
LH: loop header
LB: loop body
LE: loop exit
PB: predicated region body
PF: predicated region fallthrough
CT: control target
= control target key end

     0   :  { %8 = vsyncpa [#allocation3], 0  ;;  %s336_s0 = inlined_call_operand.hbm [shape: f32[8,32], index: 0, kind: input, shape index: {}]   ;;  %s337_s1 = inlined_call_operand.hbm [shape: f32[32,128], index: 1, kind: input, shape index: {}]   ;;  %s338_s2 = inlined_call_operand.vmem [shape: f32[1,128], index: 2, kind: input, shape index: {}]   ;;  %s339_s3 = inlined_call_operand.hbm [shape: f32[8,8], index: 3, kind: output, shape index: {}]  }
   0x1   :  { %9 = vsyncpa [#allocation6], 0 }
   0x2   :  { %10 = vsyncpa [#allocation4], 0  ;;  %s262_s12 = smov [#allocation2]   ;;  %s263_s14 = smov [#allocation5]  }
   0x3   :  { %s17_s13 = sshll.u32 %s262_s12, 4  ;;  %s26_s15 = sshll.u32 %s263_s14, 4  ;;  %s18_s13 = int_to_ptr.vmem [resolvable:$true] %s17_s13  ;;  %s290_s15 = int_to_ptr.vmem [resolvable:$true] %s26_s15 }
   0x4   :  { %s190_s18 = scalar_lea.hbm %s336_s0, 128 }
   0x5   :  { %p191_p0 = scmp.ne.s32.totalorder %s336_s0, %s190_s18  ;;  %p194_p1 = scmp.lt.u32.totalorder %s190_s18, %s336_s0 }
   0x7   :  { %p196_p2 = pnand %p194_p1, %p191_p0 }
   0x9   :  { %199 = shalt.err (!%p196_p2)
}
   0xa   :  { %s200_s23 = scalar_lea.vmem %s18_s13, 128  ;;  %p205_p4 = scmp.lt.s32.totalorder %s18_s13, %s18_s13 }
   0xb   :  { %p201_p3 = scmp.ne.s32.totalorder %s18_s13, %s200_s23  ;;  %p206_p5 = scmp.lt.s32.totalorder %s200_s23, %s200_s23 }
   0xd   :  { %p207_p6 = por %p206_p5, %p205_p4 }
   0xf   :  { %p208_p7 = pnand %p207_p6, %p201_p3 }
  0x11   :  { %211 = shalt.err (!%p208_p7)
}
  0x12   :  { %20 = dma.hbm_to_vmem [thread:$0]  %s336_s0, 128, %s18_s13, [#allocation3]  }
  0x13   :  { %s212_s28 = scalar_lea.hbm %s337_s1, 512 }
  0x14   :  { %p213_p8 = scmp.ne.s32.totalorder %s337_s1, %s212_s28  ;;  %p216_p9 = scmp.lt.u32.totalorder %s212_s28, %s337_s1 }
  0x16   :  { %p218_p10 = pnand %p216_p9, %p213_p8 }
  0x18   :  { %221 = shalt.err (!%p218_p10)
}
  0x19   :  { %s222_s6 = scalar_lea.vmem %s290_s15, 512  ;;  %p227_p12 = scmp.lt.s32.totalorder %s290_s15, %s290_s15 }
  0x1a   :  { %p223_p11 = scmp.ne.s32.totalorder %s290_s15, %s222_s6  ;;  %p228_p13 = scmp.lt.s32.totalorder %s222_s6, %s222_s6 }
  0x1c   :  { %p229_p0 = por %p228_p13, %p227_p12 }
  0x1e   :  { %p230_p1 = pnand %p229_p0, %p223_p11 }
  0x20   :  { %233 = shalt.err (!%p230_p1)
}
  0x21   :  { %s264_s0 = smov 128   ;;  %s265_s7 = smov 8  }
  0x22   :  { %32 = dma.hbm_to_vmem [thread:$0]  %s337_s1, 512, %s290_s15, [#allocation6], %s264_s0, %s264_s0, %s265_s7  }
  0x23   :  { %256 = dma.done.wait [#allocation3], 128  }
  0x24   :  { %257 = vsyncadd [#allocation3], 4294967168 }
  0x25   :  { %258 = dma.done.wait [#allocation6], 512  }
  0x26   :  { %259 = vsyncadd [#allocation6], 4294966784  ;;  %v266_v0 = vmov 0.0|0.0   ;;  %vm267_vm0 = vmmov 0   ;;  %v268_v1 = vmov 0.0   ;;  %v42_v2 = vld [vmem:[#allocation5] sm:$0xff] }
  0x27   :  { %172 = vmatprep.subr.bf16.mxu0 %v266_v0  ;;  %169 = vmatprep.mubr.msk.f32.mxu0 %vm267_vm0, %v268_v1  ;;  %v43_v3 = vld [vmem:[#allocation5 + $0x8] sm:$0xff]  ;;  %v44_v4 = vld [vmem:[#allocation5 + $0x10] sm:$0xff]  ;;  %v45_v6 = vld [vmem:[#allocation5 + $0x18] sm:$0xff]  ;;  %vm53_vm1 = vcmask 261120   ;;  %s269_s11 = smov [#allocation7]   ;;  %vm136_vm2 = vcmask 64512  }
  0x28   :  { %v173_v5 = vpack.c.bf16 %v43_v3, %v42_v2  ;;  %v176_v7 = vpack.c.bf16 %v45_v6, %v44_v4  ;;  %v41_v8 = vld [vmem:[#allocation2] sm:$0xff]  ;;  %s144_s12 = sshll.u32 %s269_s11, 4  ;;  %s145_s12 = int_to_ptr.vmem [resolvable:$true] %s144_s12 }
  0x29   :  { %v154_v9 = vld [vmem:[%s338_s2] ss:$0 sm:$0xff]  ;;  %s234_s2 = scalar_lea.vmem %s145_s12, 128  ;;  %p239_p3 = scmp.lt.s32.totalorder %s145_s12, %s145_s12 }
  0x2a   :  { %174 = vmatpush3.bf16.msra.mxu0 %v173_v5  ;;  %p235_p2 = scmp.ne.s32.totalorder %s145_s12, %s234_s2  ;;  %p240_p4 = scmp.lt.s32.totalorder %s234_s2, %s234_s2 }
  0x2b   :  { %175 = vmatprep.subr.bf16.mxu0 %v266_v0 }
  0x2c   :  { %p241_p5 = por %p240_p4, %p239_p3 }
  0x2e   :  { %177 = vmatpush3.bf16.msra.mxu0 %v176_v7  ;;  %p242_p6 = pnand %p241_p5, %p235_p2 }
  0x31   :  { %170 = vmatmul.mubr.msk.f32.vlgmr.msra.gmra.mrb[0].mxu0 %vm53_vm1, %v41_v8 }
 0x104   :  { %v123_v10 = vpop.f32.mrb[0].mxu0 }
 0x105   :  { %v124_v11 = vadd.f32 %v154_v9, %v123_v10  ;;  %v171_v12 = vpop.f32.mrb[1].mxu0 }
 0x107   :  { %127 = vmax.xlane.f32.xlu0 %v124_v11 }
 0x194   :  { %v128_v13 = vpop.xlane.xlu0 %127 }
 0x195   :  { %v129_v14 = vsub.f32 %v124_v11, %v128_v13 }
 0x197   :  { %v130_v15 = vmul.f32 1.442695, %v129_v14 }
 0x199   :  { %186 = vpow2.f32 %v130_v15 }
 0x1a3   :  { %v187_v16 = vpop.eup %186 }
 0x1a4   :  { %132 = vadd.xlane.f32.xlu0 %v187_v16 }
 0x231   :  { %v133_v17 = vpop.xlane.xlu0 %132 }
 0x232   :  { %188 = vrcp.f32 %v133_v17 }
 0x23c   :  { %v189_v18 = vpop.eup %188 }
 0x23d   :  { %v135_v19 = vmul.f32 %v189_v18, %v187_v16 }
 0x23f   :  { %137 = vst.msk [vmem:[#allocation7] sm:$0xff] %vm136_vm2, %v135_v19 }
 0x240   :  { %245 = shalt.err (!%p242_p6)
}
 0x241   :  { %s246_s15 = scalar_lea.hbm %s339_s3, 128 }
 0x242   :  { %p247_p7 = scmp.ne.s32.totalorder %s339_s3, %s246_s15  ;;  %p250_p8 = scmp.lt.u32.totalorder %s246_s15, %s339_s3 }
 0x244   :  { %p252_p9 = pnand %p250_p8, %p247_p7 }
 0x246   :  { %255 = shalt.err (!%p252_p9)
}
 0x247   :  { %147 = dma.vmem_to_hbm [thread:$0]  %s145_s12, 128, %s339_s3, [#allocation4]  }
 0x248   :  { %260 = dma.done.wait [#allocation4], 128  }
 0x249   :  { %261 = vsyncadd [#allocation4], 4294967168 }
 0x24a   :  { %151 = vsyncpa [#allocation3], 1 }
 0x24b   :  { %152 = vsyncpa [#allocation6], 1 }
 0x24c   :  { %153 = vsyncpa [#allocation4], 1 }

</bundles_post_ra>
